<compile_context>
chip_gen: v5e
topology: v5e:2x2
jax: 0.10.0
libtpu: 0.0.40
codegen_flags: <defaults>
</compile_context>

<pallas_src>
import functools

import numpy as np
import jax
import jax.numpy as jnp
from jax.experimental import pallas as pl
from jax.experimental.pallas import tpu as pltpu


def _round_up(a, b):
    return (a + b - 1) // b * b


# ---------------------------------------------------------------------------
# Kernel 1: 3x3 dilated quaternion conv as a single lane-dense im2col GEMM,
#           with fused per-channel sum / sum-of-squares for the instance norm.
# Grid: (N,) -- one sample per step, marked "parallel" (megacore / v7x).
# ---------------------------------------------------------------------------
def _conv3x3_kernel(x_ref, w_ref, mask_ref, y_ref, sum_ref, sumsq_ref, xext_ref,
                    *, W, dilation, pad_lo):
    # x_ref    : (1, Cin, L)     flattened sample, L = H*W
    # w_ref    : (Cout, 9*Cin)   im2col weight, tap-major / cin-minor
    # mask_ref : (2, L)          [0]: valid when tap shifts left  (kx == 0)
    #                            [1]: valid when tap shifts right (kx == 2)
    # y_ref    : (1, Cout, L)    conv output (lane axis = L -> dense stores)
    # sum_ref / sumsq_ref : (1, Cout, 1)  fused per-channel statistics
    # xext_ref : (Cin, pad_lo + L + pad_lo) f32 zero-extended sample
    L = x_ref.shape[2]
    d = dilation

    # Zero-extended copy of the sample so vertically out-of-range taps read 0.
    # pad_lo is 128-aligned so the interior store is an unmasked, aligned store.
    xext_ref[...] = jnp.zeros_like(xext_ref)
    xext_ref[:, pad_lo:pad_lo + L] = x_ref[0].astype(jnp.float32)

    m_left = mask_ref[0:1, :]
    m_right = mask_ref[1:2, :]

    patches = []
    for ky in range(3):
        for kx in range(3):
            shift = (ky - 1) * d * W + (kx - 1) * d
            tap = xext_ref[:, pad_lo + shift:pad_lo + shift + L]      # (Cin, L)
            if kx == 0:
                tap = tap * m_left       # kill row-wrap from the left shift
            elif kx == 2:
                tap = tap * m_right      # kill row-wrap from the right shift
            patches.append(tap)
    pmat = jnp.concatenate(patches, axis=0)                           # (9*Cin, L)

    acc = jnp.dot(w_ref[...], pmat, preferred_element_type=jnp.float32)  # (Cout, L)
    y_ref[0] = acc.astype(y_ref.dtype)

    # Fused norm statistics (avoids re-reading the conv output from HBM).
    sum_ref[0] = jnp.sum(acc, axis=1, keepdims=True)
    sumsq_ref[0] = jnp.sum(acc * acc, axis=1, keepdims=True)


def quaternion_conv3x3(xf, w9, masks, H, W, dilation=1, *, vmem_limit_bytes=None):
    """xf: (N, C, H*W) flattened NCHW input.  Returns (y, chan_sum, chan_sumsq)."""
    # TODO(synk): for very large H*W add row-strip (halo) tiling via manual DMA so
    # the per-sample im2col slab does not need to be fully VMEM-resident.
    N, C, L = xf.shape
    assert L == H * W
    pad_s = dilation * (W + 1)          # max |tap shift|
    pad_lo = _round_up(pad_s, 128)      # aligned interior for the scratch store
    kernel = functools.partial(_conv3x3_kernel, W=W, dilation=dilation,
                               pad_lo=pad_lo)
    cparams = dict(dimension_semantics=("parallel",))
    if vmem_limit_bytes is not None:
        cparams["vmem_limit_bytes"] = vmem_limit_bytes
    return pl.pallas_call(
        kernel,
        out_shape=(
            jax.ShapeDtypeStruct((N, C, L), xf.dtype),
            jax.ShapeDtypeStruct((N, C, 1), jnp.float32),
            jax.ShapeDtypeStruct((N, C, 1), jnp.float32),
        ),
        grid=(N,),
        in_specs=[
            pl.BlockSpec((1, C, L), lambda n: (n, 0, 0)),
            pl.BlockSpec((C, 9 * C), lambda n: (0, 0)),
            pl.BlockSpec((2, L), lambda n: (0, 0)),
        ],
        out_specs=(
            pl.BlockSpec((1, C, L), lambda n: (n, 0, 0)),
            pl.BlockSpec((1, C, 1), lambda n: (n, 0, 0)),
            pl.BlockSpec((1, C, 1), lambda n: (n, 0, 0)),
        ),
        scratch_shapes=[pltpu.VMEM((C, pad_lo + L + pad_lo), jnp.float32)],
        compiler_params=pltpu.CompilerParams(**cparams),
    )(xf, w9, masks)


# ---------------------------------------------------------------------------
# Kernel 2: tiled  out = relu([res +] scale * y + shift)
# Grid: (N, L/tile_l), both axes "parallel".
# ---------------------------------------------------------------------------
def _affine_relu_kernel(y_ref, scale_ref, shift_ref, o_ref):
    v = scale_ref[0] * y_ref[0].astype(jnp.float32) + shift_ref[0]
    o_ref[0] = jnp.maximum(v, 0.0).astype(o_ref.dtype)


def _affine_add_relu_kernel(y_ref, res_ref, scale_ref, shift_ref, o_ref):
    v = (res_ref[0].astype(jnp.float32)
         + scale_ref[0] * y_ref[0].astype(jnp.float32) + shift_ref[0])
    o_ref[0] = jnp.maximum(v, 0.0).astype(o_ref.dtype)


def _pick_tile_l(L, max_tile=8192):
    if L <= max_tile:
        return L
    best = L
    for t in range(128, max_tile + 1, 128):
        if L % t == 0:
            best = t
    return best


def apply_norm_residual_relu(y, scale, shift, res=None, *, tile_l=None,
                             vmem_limit_bytes=None):
    N, C, L = y.shape
    tl = tile_l if tile_l is not None else _pick_tile_l(L)
    if L % tl != 0:
        tl = L
    data_spec = pl.BlockSpec((1, C, tl), lambda n, l: (n, 0, l))
    scale_spec = pl.BlockSpec((1, C, 1), lambda n, l: (0, 0, 0))
    shift_spec = pl.BlockSpec((1, C, 1), lambda n, l: (n, 0, 0))
    if res is None:
        kernel = _affine_relu_kernel
        operands = (y, scale, shift)
        in_specs = [data_spec, scale_spec, shift_spec]
    else:
        kernel = _affine_add_relu_kernel
        operands = (y, res, scale, shift)
        in_specs = [data_spec, data_spec, scale_spec, shift_spec]
    cparams = dict(dimension_semantics=("parallel", "parallel"))
    if vmem_limit_bytes is not None:
        cparams["vmem_limit_bytes"] = vmem_limit_bytes
    return pl.pallas_call(
        kernel,
        out_shape=jax.ShapeDtypeStruct((N, C, L), y.dtype),
        grid=(N, L // tl),
        in_specs=in_specs,
        out_specs=data_spec,
        compiler_params=pltpu.CompilerParams(**cparams),
    )(*operands)


# ---------------------------------------------------------------------------
# Tiny helpers (plain XLA on O(N*C)-sized data).
# ---------------------------------------------------------------------------
def _norm_affine_params(chan_sum, chan_sumsq, gamma, beta, H, W, eps=1e-5):
    """Finalize the fused conv statistics into per-channel scale / shift."""
    N, C, _ = chan_sum.shape
    Cq = C // 4
    cnt = Cq * H * W                                                   # per (sample, component)
    group_sum = jnp.sum(chan_sum[..., 0].reshape(N, 4, Cq), axis=2)    # (N, 4)
    mean = group_sum / cnt                                             # (N, 4)
    var = (jnp.sum(chan_sumsq) - cnt * jnp.sum(mean * mean)) / (N * cnt)
    inv = jax.lax.rsqrt(var + eps)
    gamma_full = jnp.tile(gamma.reshape(-1), 4)                        # (C,)
    scale = (gamma_full * inv).astype(jnp.float32)                     # (C,)
    mean_full = jnp.repeat(mean, Cq, axis=1)                           # (N, C)
    shift = beta.reshape(1, C) - scale[None, :] * mean_full            # (N, C)
    return scale.reshape(1, C, 1), shift.reshape(N, C, 1).astype(jnp.float32)


def _edge_masks(H, W, dilation):
    col = np.arange(H * W) % W
    m_left = (col >= dilation).astype(np.float32)       # tap shifted left  (kx == 0)
    m_right = (col < W - dilation).astype(np.float32)   # tap shifted right (kx == 2)
    return jnp.asarray(np.stack([m_left, m_right], axis=0))


def _expand_weight(w_oihw):
    # OIHW (Cout, Cin, 3, 3) -> (Cout, 9*Cin), tap-major / cin-minor, matching the
    # order in which the conv kernel stacks its 9 shifted patches.
    Cout, Cin, _, _ = w_oihw.shape
    return jnp.transpose(w_oihw, (0, 2, 3, 1)).reshape(Cout, 9 * Cin)


def make_quaternion_weight(key, C, scale=0.1):
    """Quaternion (Hamilton-product) expansion of 4 component kernels -> OIHW."""
    Cq = C // 4
    kr, ki, kj, kk = jax.random.split(key, 4)
    r = scale * jax.random.normal(kr, (Cq, Cq, 3, 3), jnp.float32)
    i = scale * jax.random.normal(ki, (Cq, Cq, 3, 3), jnp.float32)
    j = scale * jax.random.normal(kj, (Cq, Cq, 3, 3), jnp.float32)
    k = scale * jax.random.normal(kk, (Cq, Cq, 3, 3), jnp.float32)
    row_r = jnp.concatenate([r, -i, -j, -k], axis=1)
    row_i = jnp.concatenate([i, r, -k, j], axis=1)
    row_j = jnp.concatenate([j, k, r, -i], axis=1)
    row_k = jnp.concatenate([k, -j, i, r], axis=1)
    return jnp.concatenate([row_r, row_i, row_j, row_k], axis=0)       # (C, C, 3, 3)


# ---------------------------------------------------------------------------
# ResidualBlock forward: y = relu(norm1(conv1(x))); out = relu(x + norm2(conv2(y)))
# ---------------------------------------------------------------------------
def residual_block_forward(x_nchw, params, dilation=1, *, tile_l=None):
    N, C, H, W = x_nchw.shape
    assert C % 4 == 0, "quaternion layers need channels divisible by 4"
    L = H * W
    xf = x_nchw.reshape(N, C, L)                   # free reshape, stays NCHW-major
    masks = _edge_masks(H, W, dilation)
    w1 = _expand_weight(params["w1"])
    w2 = _expand_weight(params["w2"])

    y1, s1, q1 = quaternion_conv3x3(xf, w1, masks, H, W, dilation)
    scale1, shift1 = _norm_affine_params(s1, q1, params["gamma1"], params["beta1"], H, W)
    h1 = apply_norm_residual_relu(y1, scale1, shift1, tile_l=tile_l)          # relu(norm1(conv1 x))

    y2, s2, q2 = quaternion_conv3x3(h1, w2, masks, H, W, dilation)
    scale2, shift2 = _norm_affine_params(s2, q2, params["gamma2"], params["beta2"], H, W)
    out = apply_norm_residual_relu(y2, scale2, shift2, res=xf, tile_l=tile_l)  # relu(x + norm2(conv2 h1))
    return out.reshape(N, C, H, W)


# ---------------------------------------------------------------------------
# Pure-JAX reference (NCHW, mirrors the PyTorch module) for verification.
# ---------------------------------------------------------------------------
def _ref_forward(x, params, dilation=1):
    def conv(inp, w):
        return jax.lax.conv_general_dilated(
            inp, w, window_strides=(1, 1),
            padding=[(dilation, dilation)] * 2,
            rhs_dilation=(dilation, dilation),
            dimension_numbers=("NCHW", "OIHW", "NCHW"),
            precision=jax.lax.Precision.HIGHEST)

    def qin(inp, gamma, beta, eps=1e-5):
        comps = jnp.split(inp, 4, axis=1)
        deltas = [c - jnp.mean(c, axis=(1, 2, 3), keepdims=True) for c in comps]
        var = jnp.mean(sum(d * d for d in deltas))
        denom = jnp.sqrt(var + eps)
        betas = jnp.split(beta, 4, axis=1)
        return jnp.concatenate(
            [gamma * (d / denom) + b for d, b in zip(deltas, betas)], axis=1)

    y = jax.nn.relu(qin(conv(x, params["w1"]), params["gamma1"], params["beta1"]))
    y = qin(conv(y, params["w2"]), params["gamma2"], params["beta2"])
    return jax.nn.relu(x + y)


if __name__ == "__main__":
    N, C, H, W = 2, 8, 16, 16          # channel_num must be a multiple of 4

    key = jax.random.PRNGKey(0)
    kx_, kw1, kw2 = jax.random.split(key, 3)
    x = jax.random.normal(kx_, (N, C, H, W), jnp.float32)

    params = {
        "w1": make_quaternion_weight(kw1, C),
        "w2": make_quaternion_weight(kw2, C),
        # QuaternionInstanceNorm2d.__init__: gamma=1.0 (1, C//4, 1, 1), beta=0 (1, C, 1, 1)
        "gamma1": jnp.full((1, C // 4, 1, 1), 1.0, jnp.float32),
        "beta1": jnp.zeros((1, C, 1, 1), jnp.float32),
        "gamma2": jnp.full((1, C // 4, 1, 1), 1.0, jnp.float32),
        "beta2": jnp.zeros((1, C, 1, 1), jnp.float32),
    }

    for dilation in (1, 2):
        out = residual_block_forward(x, params, dilation=dilation, tile_l=128)
        out = jax.block_until_ready(out)
        ref = jax.block_until_ready(_ref_forward(x, params, dilation=dilation))
        assert out.shape == (N, C, H, W)
        max_err = float(jnp.max(jnp.abs(out - ref)))
        assert max_err < 3e-3, f"dilation={dilation}: max abs err {max_err}"

    print("KERNEL_OK")
</pallas_src>

<mosaic_0001>
module attributes {stable_mosaic.version = 11 : i64} {
  func.func @_conv3x3_kernel(%arg0: i32, %arg1: memref<1x8x256xf32, #tpu.memory_space<vmem>>, %arg2: memref<8x72xf32, #tpu.memory_space<vmem>>, %arg3: memref<2x256xf32, #tpu.memory_space<vmem>>, %arg4: memref<1x8x256xf32, #tpu.memory_space<vmem>>, %arg5: memref<1x8x1xf32, #tpu.memory_space<vmem>>, %arg6: memref<1x8x1xf32, #tpu.memory_space<vmem>>, %arg7: memref<8x512xf32, #tpu.memory_space<vmem>>) attributes {dimension_semantics = [#tpu.dimension_semantics<parallel>], iteration_bounds = array<i64: 2>, scalar_prefetch = 0 : i64, scratch_operands = 1 : i64, tpu.core_type = #tpu.core_type<tc>, window_params = [{transform_indices = @transform_0, window_bounds = array<i64: 1, 8, 256>}, {pipeline_mode = #tpu.pipeline_mode<synchronous>, transform_indices = @transform_1, window_bounds = array<i64: 8, 72>}, {pipeline_mode = #tpu.pipeline_mode<synchronous>, transform_indices = @transform_2, window_bounds = array<i64: 2, 256>}, {transform_indices = @transform_3, window_bounds = array<i64: 1, 8, 256>}, {transform_indices = @transform_4, window_bounds = array<i64: 1, 8, 1>}, {transform_indices = @transform_5, window_bounds = array<i64: 1, 8, 1>}]} {
    %cst = arith.constant 0.000000e+00 : f32
    %0 = vector.broadcast %cst : f32 to vector<8x512xf32>
    %c0 = arith.constant 0 : index
    %c0_0 = arith.constant 0 : index
    %1 = vector.load %arg7[%c0, %c0_0] : memref<8x512xf32, #tpu.memory_space<vmem>>, vector<8x512xf32>
    tpu.vector_store %arg7[%c0, %c0_0], %0 {strides = array<i32>} : memref<8x512xf32, #tpu.memory_space<vmem>>, vector<8x512xf32>,
    %c0_1 = arith.constant 0 : index
    %c0_2 = arith.constant 0 : index
    %c0_3 = arith.constant 0 : index
    %2 = vector.load %arg1[%c0_1, %c0_2, %c0_3] : memref<1x8x256xf32, #tpu.memory_space<vmem>>, vector<1x8x256xf32>
    %3 = vector.shape_cast %2 : vector<1x8x256xf32> to vector<8x256xf32>
    %c0_4 = arith.constant 0 : index
    %c128 = arith.constant 128 : index
    %4 = vector.load %arg7[%c0_4, %c128] : memref<8x512xf32, #tpu.memory_space<vmem>>, vector<8x256xf32>
    tpu.vector_store %arg7[%c0_4, %c128], %3 {strides = array<i32>} : memref<8x512xf32, #tpu.memory_space<vmem>>, vector<8x256xf32>,
    %c0_5 = arith.constant 0 : index
    %c0_6 = arith.constant 0 : index
    %5 = vector.load %arg3[%c0_5, %c0_6] : memref<2x256xf32, #tpu.memory_space<vmem>>, vector<1x256xf32>
    %c1 = arith.constant 1 : index
    %c0_7 = arith.constant 0 : index
    %6 = vector.load %arg3[%c1, %c0_7] : memref<2x256xf32, #tpu.memory_space<vmem>>, vector<1x256xf32>
    %c0_8 = arith.constant 0 : index
    %c111 = arith.constant 111 : index
    %7 = vector.load %arg7[%c0_8, %c111] : memref<8x512xf32, #tpu.memory_space<vmem>>, vector<8x256xf32>
    %8 = vector.broadcast %5 : vector<1x256xf32> to vector<8x256xf32>
    %9 = arith.mulf %7, %8 : vector<8x256xf32>
    %c0_9 = arith.constant 0 : index
    %c112 = arith.constant 112 : index
    %10 = vector.load %arg7[%c0_9, %c112] : memref<8x512xf32, #tpu.memory_space<vmem>>, vector<8x256xf32>
    %c0_10 = arith.constant 0 : index
    %c113 = arith.constant 113 : index
    %11 = vector.load %arg7[%c0_10, %c113] : memref<8x512xf32, #tpu.memory_space<vmem>>, vector<8x256xf32>
    %12 = vector.broadcast %6 : vector<1x256xf32> to vector<8x256xf32>
    %13 = arith.mulf %11, %12 : vector<8x256xf32>
    %c0_11 = arith.constant 0 : index
    %c127 = arith.constant 127 : index
    %14 = vector.load %arg7[%c0_11, %c127] : memref<8x512xf32, #tpu.memory_space<vmem>>, vector<8x256xf32>
    %15 = vector.broadcast %5 : vector<1x256xf32> to vector<8x256xf32>
    %16 = arith.mulf %14, %15 : vector<8x256xf32>
    %c0_12 = arith.constant 0 : index
    %c128_13 = arith.constant 128 : index
    %17 = vector.load %arg7[%c0_12, %c128_13] : memref<8x512xf32, #tpu.memory_space<vmem>>, vector<8x256xf32>
    %c0_14 = arith.constant 0 : index
    %c129 = arith.constant 129 : index
    %18 = vector.load %arg7[%c0_14, %c129] : memref<8x512xf32, #tpu.memory_space<vmem>>, vector<8x256xf32>
    %19 = vector.broadcast %6 : vector<1x256xf32> to vector<8x256xf32>
    %20 = arith.mulf %18, %19 : vector<8x256xf32>
    %c0_15 = arith.constant 0 : index
    %c143 = arith.constant 143 : index
    %21 = vector.load %arg7[%c0_15, %c143] : memref<8x512xf32, #tpu.memory_space<vmem>>, vector<8x256xf32>
    %22 = vector.broadcast %5 : vector<1x256xf32> to vector<8x256xf32>
    %23 = arith.mulf %21, %22 : vector<8x256xf32>
    %c0_16 = arith.constant 0 : index
    %c144 = arith.constant 144 : index
    %24 = vector.load %arg7[%c0_16, %c144] : memref<8x512xf32, #tpu.memory_space<vmem>>, vector<8x256xf32>
    %c0_17 = arith.constant 0 : index
    %c145 = arith.constant 145 : index
    %25 = vector.load %arg7[%c0_17, %c145] : memref<8x512xf32, #tpu.memory_space<vmem>>, vector<8x256xf32>
    %26 = vector.broadcast %6 : vector<1x256xf32> to vector<8x256xf32>
    %27 = arith.mulf %25, %26 : vector<8x256xf32>
    %28 = tpu.concatenate %9, %10, %13, %16, %17, %20, %23, %24, %27 in 0 : vector<8x256xf32>, vector<8x256xf32>, vector<8x256xf32>, vector<8x256xf32>, vector<8x256xf32>, vector<8x256xf32>, vector<8x256xf32>, vector<8x256xf32>, vector<8x256xf32> -> vector<72x256xf32>
    %c0_18 = arith.constant 0 : index
    %c0_19 = arith.constant 0 : index
    %29 = vector.load %arg2[%c0_18, %c0_19] : memref<8x72xf32, #tpu.memory_space<vmem>>, vector<8x72xf32>
    %cst_20 = arith.constant dense<0.000000e+00> : vector<8x256xf32>
    %30 = tpu.matmul %29, %28, %cst_20 {dimension_numbers = #tpu.dot_dimension_numbers<[1], [0], [0], [1], [0, 0, 1, 1], [], []>} : vector<8x72xf32>, vector<72x256xf32>, vector<8x256xf32> -> vector<8x256xf32>
    %c0_21 = arith.constant 0 : index
    %c0_22 = arith.constant 0 : index
    %c0_23 = arith.constant 0 : index
    %31 = vector.load %arg4[%c0_21, %c0_22, %c0_23] : memref<1x8x256xf32, #tpu.memory_space<vmem>>, vector<1x8x256xf32>
    %32 = vector.shape_cast %31 : vector<1x8x256xf32> to vector<8x256xf32>
    %33 = vector.shape_cast %30 : vector<8x256xf32> to vector<1x8x256xf32>
    tpu.vector_store %arg4[%c0_21, %c0_22, %c0_23], %33 {strides = array<i32>} : memref<1x8x256xf32, #tpu.memory_space<vmem>>, vector<1x8x256xf32>,
    %cst_24 = arith.constant dense<0.000000e+00> : vector<8xf32>
    %34 = vector.multi_reduction <add>, %30, %cst_24 [1] : vector<8x256xf32> to vector<8xf32>
    %35 = vector.shape_cast %34 : vector<8xf32> to vector<8x1xf32>
    %c0_25 = arith.constant 0 : index
    %c0_26 = arith.constant 0 : index
    %c0_27 = arith.constant 0 : index
    %36 = vector.load %arg5[%c0_25, %c0_26, %c0_27] : memref<1x8x1xf32, #tpu.memory_space<vmem>>, vector<1x8x1xf32>
    %37 = vector.shape_cast %36 : vector<1x8x1xf32> to vector<8x1xf32>
    %38 = vector.shape_cast %35 : vector<8x1xf32> to vector<1x8x1xf32>
    tpu.vector_store %arg5[%c0_25, %c0_26, %c0_27], %38 {strides = array<i32>} : memref<1x8x1xf32, #tpu.memory_space<vmem>>, vector<1x8x1xf32>,
    %39 = arith.mulf %30, %30 : vector<8x256xf32>
    %cst_28 = arith.constant dense<0.000000e+00> : vector<8xf32>
    %40 = vector.multi_reduction <add>, %39, %cst_28 [1] : vector<8x256xf32> to vector<8xf32>
    %41 = vector.shape_cast %40 : vector<8xf32> to vector<8x1xf32>
    %c0_29 = arith.constant 0 : index
    %c0_30 = arith.constant 0 : index
    %c0_31 = arith.constant 0 : index
    %42 = vector.load %arg6[%c0_29, %c0_30, %c0_31] : memref<1x8x1xf32, #tpu.memory_space<vmem>>, vector<1x8x1xf32>
    %43 = vector.shape_cast %42 : vector<1x8x1xf32> to vector<8x1xf32>
    %44 = vector.shape_cast %41 : vector<8x1xf32> to vector<1x8x1xf32>
    tpu.vector_store %arg6[%c0_29, %c0_30, %c0_31], %44 {strides = array<i32>} : memref<1x8x1xf32, #tpu.memory_space<vmem>>, vector<1x8x1xf32>,
    return
  }
  func.func @transform_0(%arg0: i32) -> (i32, i32, i32) {
    %c0_i32 = arith.constant 0 : i32
    %c0_i32_0 = arith.constant 0 : i32
    %c0_i32_1 = arith.constant 0 : i32
    return %arg0, %c0_i32, %c0_i32_0 : i32, i32, i32
  }
  func.func @transform_1(%arg0: i32) -> (i32, i32) {
    %c0_i32 = arith.constant 0 : i32
    %c0_i32_0 = arith.constant 0 : i32
    %c0_i32_1 = arith.constant 0 : i32
    return %c0_i32, %c0_i32_0 : i32, i32
  }
  func.func @transform_2(%arg0: i32) -> (i32, i32) {
    %c0_i32 = arith.constant 0 : i32
    %c0_i32_0 = arith.constant 0 : i32
    %c0_i32_1 = arith.constant 0 : i32
    return %c0_i32, %c0_i32_0 : i32, i32
  }
  func.func @transform_3(%arg0: i32) -> (i32, i32, i32) {
    %c0_i32 = arith.constant 0 : i32
    %c0_i32_0 = arith.constant 0 : i32
    %c0_i32_1 = arith.constant 0 : i32
    return %arg0, %c0_i32, %c0_i32_0 : i32, i32, i32
  }
  func.func @transform_4(%arg0: i32) -> (i32, i32, i32) {
    %c0_i32 = arith.constant 0 : i32
    %c0_i32_0 = arith.constant 0 : i32
    %c0_i32_1 = arith.constant 0 : i32
    return %arg0, %c0_i32, %c0_i32_0 : i32, i32, i32
  }
  func.func @transform_5(%arg0: i32) -> (i32, i32, i32) {
    %c0_i32 = arith.constant 0 : i32
    %c0_i32_0 = arith.constant 0 : i32
    %c0_i32_1 = arith.constant 0 : i32
    return %arg0, %c0_i32, %c0_i32_0 : i32, i32, i32
  }
}

</mosaic_0001>

<bundles_post_ra>
// kernel: tpu_custom_call.1
= control target key start
LH: loop header
LB: loop body
LE: loop exit
PB: predicated region body
PF: predicated region fallthrough
CT: control target
= control target key end

     0   :  { %11 = vsyncpa [#allocation4], 0  ;;  %s1471_s0 = inlined_call_operand.hbm [shape: f32[2,8,256], index: 0, kind: input, shape index: {}]   ;;  %s1472_s1 = inlined_call_operand.hbm [shape: f32[8,72], index: 1, kind: input, shape index: {}]   ;;  %s1473_s2 = inlined_call_operand.hbm [shape: f32[2,256], index: 2, kind: input, shape index: {}]   ;;  %s1474_s3 = inlined_call_operand.hbm [shape: f32[2,8,256], index: 3, kind: output, shape index: {0}]   ;;  %s1475_s4 = inlined_call_operand.vmem [shape: f32[2,8,1], index: 4, kind: output, shape index: {1}]   ;;  %s1476_s5 = inlined_call_operand.vmem [shape: f32[2,8,1], index: 5, kind: output, shape index: {2}]  }
   0x1   :  { %13 = vsyncpa [#allocation4 + $0x1], 0 }
   0x2   :  { %14 = vsyncpa [#allocation7], 0 }
   0x3   :  { %15 = vsyncpa [#allocation5], 0 }
   0x4   :  { %17 = vsyncpa [#allocation5 + $0x1], 0  ;;  %s1210_s18 = smov 0   ;;  %s1212_s19 = smov 0  }
   0x5   :  { %s1214_s20 = smov 0   ;;  %s1216_s21 = smov 0  }
   0x6 LB: > { %s1231_s22 = sadd.s32 4294967295, %s1163_s21   ;;  %s794_s23 = sadd.s32 4294967294, %s1163_s21   ;;  %s1163_s21 = sphi %s1216_s21, %s1486_s21   ;;  %s1159_s20 = sphi %s1214_s20, %s1485_s20   ;;  %s1155_s19 = sphi %s1212_s19, %s1484_s19   ;;  %s1151_s18 = sphi %s1210_s18, %s1483_s18  }
   0x7   : > { %p43_p0 = scmp.ne.s32.totalorder %s1155_s19, %s1151_s18  ;;  %p44_p1 = scmp.eq.s32.totalorder %s1231_s22, 0 }
   0x8   : > { %p109_p2 = scmp.eq.s32.totalorder %s1231_s22, 1  ;;  %p115_p3 = scmp.eq.s32.totalorder %s794_s23, 1 }
   0x9   : > { %p1240_p4 = por %p44_p1, %p43_p0  ;;  %p795_p5 = scmp.ge.s32.totalorder %s1163_s21, 1 }
   0xa   : > { %p1245_p6 = por %p115_p3, %p43_p0  ;;  %p174_p7 = scmp.lt.s32.totalorder %s1163_s21, 3 }
   0xb   : > { %s186_s28 = sshll.u32 %s1472_s1, 4  ;;  %s1165_s30 = smov [#allocation6]   ;;  %s187_s28 = int_to_ptr.hbm [resolvable:$true] %s186_s28 }
   0xc   : > { %p1253_p8 = pnand %p795_p5, %p174_p7  ;;  %s188_s6 = sshll.u32 %s1165_s30, 4  ;;  %s189_s6 = int_to_ptr.vmem [resolvable:$true] %s188_s6 }
   0xd   : > { %s198_s9 = sshll.u32 %s1473_s2, 4  ;;  %s1166_s10 = smov [#allocation8]   ;;  %s199_s9 = int_to_ptr.hbm [resolvable:$true] %s198_s9 }
   0xe   : > { %p830_p10 = pneg %p1253_p8  ;;  %s200_s11 = sshll.u32 %s1166_s10, 4  ;;  %s201_s11 = int_to_ptr.vmem [resolvable:$true] %s200_s11 }
   0xf   : > { %s1266_s12 = sadd.s32 1, %s1163_s21   ;;  %s30_s13 = sadd.s32 1, %s1159_s20 }
  0x10   : > { %p831_p11 = pnand %p830_p10, %p44_p1  ;;  %s27_s14 = ssub.s32 %s1163_s21, %s1266_s12 }
  0x11   : > { %p37_p12 = scmp.ne.s32.totalorder %s1159_s20, %s1155_s19  ;;  %p28_p13 = scmp.eq.s32.totalorder %s27_s14, 0 }
  0x12   : > { %833 = dma.hbm_to_vmem [thread:$0]  (!%p831_p11), %s187_s28, 128, %s189_s6, [#allocation7]  }
  0x13   : > { %836 = dma.hbm_to_vmem [thread:$0]  (!%p831_p11), %s199_s9, 64, %s201_s11, [#allocation7]  }
  0x14   : > { %p38_p0 = scmp.eq.s32.totalorder %s1163_s21, 0  ;;  %p1276_p3 = por %p109_p2, %p37_p12 }
  0x15   : > { %p847_p5 = scmp.lt.s32.totalorder %s1163_s21, 2  ;;  %s211_s17 = sand.u32 1, %s1159_s20  }
  0x16   : > { %s1282_s16 = scalar_select %p28_p13, %s1159_s20, %s30_s13  }
  0x17   : > { %p39_p7 = por %p38_p0, %p37_p12  ;;  %s799_s23 = sshll.u32 %s211_s17, 4 }
  0x18   : > { %s816_s26 = sshll.u32 %s1163_s21, 4  ;;  %s215_s6 = scalar_lea.vmem [#allocation3], %s799_s23 }
  0x19   : > { %s220_s30 = scalar_lea.hbm %s1471_s0, %s816_s26  ;;  %s224_s7 = sshll.u32 %s215_s6, 4  ;;  %s225_s7 = int_to_ptr.vmem [resolvable:$true] %s224_s7 }
  0x1a   : > { %s222_s8 = sshll.u32 %s220_s30, 4  ;;  %p1289_p2 = pnand %p847_p5, %p39_p7  ;;  %s223_s8 = int_to_ptr.hbm [resolvable:$true] %s222_s8 }
  0x1b   : > { %s212_s10 = scalar_lea.sflag [#allocation4], %s211_s17  ;;  %s1063_s11 = sshra.s32 %s223_s8, 4  ;;  %s1064_s11 = int_to_ptr.hbm [resolvable:$true] %s1063_s11 }
  0x1c   : > { %s1065_s13 = scalar_lea.hbm %s1064_s11, 16  ;;  %p1067_p11 = pneg %p1289_p2 }
  0x1d   : > { %p1066_p10 = scmp.ne.s32.totalorder %s1064_s11, %s1065_s13  ;;  %s1070_s26 = scalar_lea.hbm %s1471_s0, 32 }
  0x1e   : > { %p1071_p0 = scmp.lt.s32.totalorder %s1064_s11, %s1471_s0  ;;  %p1072_p5 = scmp.lt.s32.totalorder %s1070_s26, %s1065_s13 }
  0x1f   : > { %p1068_p12 = pnand %p1067_p11, %p1066_p10 }
  0x20   : > { %p1073_p7 = por %p1072_p5, %p1071_p0 }
  0x21   : > { %p1069_p13 = pneg %p1068_p12 }
  0x23   : > { %p1074_p9 = pnand %p1073_p7, %p1069_p13 }
  0x25   : > { %1077 = shalt.err (!%p1074_p9)
}
  0x26   : > { %840 = dma.hbm_to_vmem [thread:$0]  (!%p1289_p2), %s223_s8, 256, %s225_s7, %s212_s10  }
  0x27   : > { %233 = sbr.rel (%p1253_p8) target bundleno = 741 (0x2e5), region = 32  ;;  %s1306_s17 = sand.u32 (!%p1253_p8), 1, %s1155_s19  }
  0x28   : > { %s803_s30 = sshll.u32 (!%p1253_p8), %s1306_s17, 4  ;;  %s236_s6 = scalar_lea.sflag (!%p1253_p8), [#allocation4], %s1306_s17 }
  0x29   : > { %s239_s11 = scalar_lea.vmem (!%p1253_p8), [#allocation3], %s803_s30 }
  0x2c   : > { %1138 = dma.done.wait (%p1240_p4), %s236_s6, 256  }
  0x2d   : > { %1140 = vsyncadd (%p1240_p4), %s236_s6, 4294967040 }
  0x2e   : > { %1142 = dma.done.wait (%p44_p1), [#allocation7], 192  }
  0x2f   : > { %1144 = vsyncadd (%p44_p1), [#allocation7], 4294967104  ;;  %v303_v0 = vld [vmem:[#allocation8 + $0x1] ss:$2 sm:$0x3]  ;;  %s1167_s29 = smov 17  }
  0x30   : > { %v301_v1 = vld [vmem:[#allocation8] ss:$2 sm:$0x3]  ;;  %v323_v2 = vperm.slane %v303_v0, 0  ;;  %s1168_s7 = smov 15   ;;  %s1169_s8 = smov 1  }
  0x31   : > { %v1320_v3 = vperm.slane %v301_v1, 0  ;;  %v324_v4 = vperm.slane %v303_v0, 1  ;;  %v1324_v5 = vperm.slane %v301_v1, 1  ;;  %s1170_s24 = smov 127   ;;  %s1171_s9 = smov 113   ;;  %v1332_v6 = vld [vmem:[%s239_s11] sm:$0xff] }
  0x32   : > { %376 = vrot.lane.b32.xlu0 %v323_v2, %s1167_s29  ;;  %352 = vrot.lane.b32.xlu2 %v323_v2, %s1169_s8  ;;  %v1334_v7 = vld [vmem:[%s239_s11 + $0x8] sm:$0xff]  ;;  %s1172_s10 = smov 95   ;;  %s1173_s13 = smov 111   ;;  %v1174_v9 = vmov 0.0   ;;  %vm368_vm0 = vcmask 121856   ;;  %vm329_vm1 = vcmask 924672  }
  0x33   : > { %364 = vrot.lane.b32.xlu1 %v1320_v3, %s1168_s7  ;;  %v898_v8 = vpack.i.bf16 %v1334_v7, %v1332_v6  ;;  %s1175_s14 = smov 94   ;;  %s1176_s23 = smov 96   ;;  %vm380_vm2 = vcmask 138240   ;;  %vm356_vm3 = vcmask 7168   ;;  %vm341_vm4 = vcmask 1039360  }
  0x34   : > { %s1177_s26 = smov 110   ;;  %s1178_s27 = smov 112   ;;  %v933_v45 = vpack.i.bf16 %v1332_v6, %v1174_v9  ;;  %vm314_vm5 = vcmask 908288   ;;  %vm461_vm6 = vcmask 777216   ;;  %vm473_vm7 = vcmask 769024  }
  0x35   : > { %s1179_s28 = smov 126   ;;  %vm449_vm8 = vcmask 785408   ;;  %vm437_vm9 = vcmask 900096   ;;  %vm408_vm10 = vcmask 1031168   ;;  %vm420_vm11 = vcmask 916480   ;;  %s817_s6 = sshll.u32 %s1231_s22, 4 }
  0x36   : > { %vm570_vm12 = vcmask 588800  }
  0x3a   : > { %378 = vrot.lane.b32.xlu0 %v324_v4, %s1167_s29  ;;  %354 = vrot.lane.b32.xlu2 %v324_v4, %s1169_s8  ;;  %s272_s8 = scalar_lea.vmem [#allocation9], %s803_s30 }
  0x3b   : > { %366 = vrot.lane.b32.xlu1 %v1324_v5, %s1168_s7  ;;  %s646_s7 = scalar_lea.hbm %s1474_s3, %s817_s6 }
  0x42   : > { %337 = vrot.lane.b32.xlu0 %v1320_v3, %s1170_s24  ;;  %325 = vrot.lane.b32.xlu2 %v323_v2, %s1171_s9 }
  0x43   : > { %339 = vrot.lane.b32.xlu1 %v1324_v5, %s1170_s24 }
  0x4a   : > { %327 = vrot.lane.b32.xlu0 %v324_v4, %s1171_s9  ;;  %s650_s9 = sshll.u32 %s646_s7, 4  ;;  %s651_s9 = int_to_ptr.hbm [resolvable:$true] %s650_s9 }
  0x4b   : > { %459 = vrot.lane.b32.xlu1 %v1174_v9, %s1172_s10 }
  0x52   : > { %899 = vrot.lane.b32.xlu0 %v898_v8, %s1172_s10  ;;  %s627_s10 = scalar_lea.sflag [#allocation5], %s1306_s17 }
  0x5a   : > { %904 = vrot.lane.b32.xlu0 %v898_v8, %s1173_s13 }
  0x8c   : > { %v353_v12 = vpop.permute.xlu2 %352 }
  0x8d   : > { %v361_v38 = vmul.f32 %v353_v12, %v1332_v6 }
  0x94   : > { %v355_v17 = vpop.permute.xlu2 %354 }
  0x95   : > { %v363_v18 = vmul.f32 0.0, %v355_v17  ;;  %v357_v37 = vsel %vm356_vm3, %v353_v12, %v355_v17 }
  0x96   : > { %v362_v39 = vmul.f32 %v357_v37, %v1334_v7 }
  0x98   : > { %v918_v40 = vpack.i.bf16 %v362_v39, %v361_v38 }
  0x9c   : > { %v326_v20 = vpop.permute.xlu2 %325 }
  0x9d   : > { %v334_v24 = vmul.f32 0.0, %v326_v20 }
  0xa4   : > { %v377_v10 = vpop.permute.xlu0 %376 }
  0xa5   : > { %v365_v11 = vpop.permute.xlu1 %364  ;;  %v385_v34 = vmul.f32 %v377_v10, %v1332_v6 }
  0xa6   : > { %v373_v30 = vmul.f32 %v365_v11, %v1332_v6 }
  0xac   : > { %v379_v13 = vpop.permute.xlu0 %378 }
  0xad   : > { %v367_v14 = vpop.permute.xlu1 %366  ;;  %v387_v15 = vmul.f32 0.0, %v379_v13  ;;  %v381_v28 = vsel %vm380_vm2, %v377_v10, %v379_v13 }
  0xae   : > { %v375_v16 = vmul.f32 0.0, %v367_v14  ;;  %v369_v23 = vsel %vm368_vm0, %v365_v11, %v367_v14  ;;  %v386_v33 = vmul.f32 %v381_v28, %v1334_v7 }
  0xaf   : > { %471 = vrot.lane.b32.xlu2 %v387_v15, %s1175_s14  ;;  %v374_v31 = vmul.f32 %v369_v23, %v1334_v7 }
  0xb0   : > { %447 = vrot.lane.b32.xlu0 %v375_v16, %s1176_s23  ;;  %v908_v36 = vpack.i.bf16 %v386_v33, %v385_v34 }
  0xb1   : > { %v913_v35 = vpack.i.bf16 %v374_v31, %v373_v30 }
  0xb4   : > { %v338_v19 = vpop.permute.xlu0 %337 }
  0xb5   : > { %v340_v21 = vpop.permute.xlu1 %339  ;;  %v346_v42 = vmul.f32 0.0, %v338_v19 }
  0xb6   : > { %v348_v22 = vmul.f32 %v340_v21, %v1334_v7  ;;  %v342_v41 = vsel %vm341_vm4, %v338_v19, %v340_v21 }
  0xb7   : > { %435 = vrot.lane.b32.xlu2 %v363_v18, %s1177_s26  ;;  %v347_v43 = vmul.f32 %v342_v41, %v1332_v6 }
  0xb9   : > { %v923_v44 = vpack.i.bf16 %v347_v43, %v346_v42 }
  0xbc   : > { %v328_v25 = vpop.permute.xlu0 %327 }
  0xbd   : > { %v330_v26 = vsel %vm329_vm1, %v326_v20, %v328_v25  ;;  %v336_v27 = vmul.f32 %v328_v25, %v1334_v7  ;;  %v460_v55 = vpop.permute.xlu1 %459 }
  0xbe   : > { %v335_v29 = vmul.f32 %v330_v26, %v1332_v6 }
  0xbf   : > { %418 = vrot.lane.b32.xlu2 %v348_v22, %s1178_s27  ;;  %406 = vrot.lane.b32.xlu1 %v336_v27, %s1179_s28 }
  0xc0   : > { %v928_v32 = vpack.i.bf16 %v335_v29, %v334_v24 }
  0xc2   : > { %929 = vrot.lane.b32.xlu0 %v928_v32, %s1179_s28 }
  0xc4   : > { %v1366_v46 = vpop.permute.xlu0 %899 }
  0xc5   : > { %v902_v52 = vunpack.i.h.bf16 %v1366_v46  ;;  %v901_v53 = vunpack.i.l.bf16 %v1366_v46 }
  0xc7   : > { %909 = vrot.lane.b32.xlu1 %v908_v36, %s1175_s14  ;;  %914 = vrot.lane.b32.xlu2 %v913_v35, %s1176_s23  ;;  %v462_v54 = vsel %vm461_vm6, %v901_v53, %v902_v52  ;;  %v463_v56 = vsel %vm461_vm6, %v902_v52, %v460_v55 }
  0xc8   : > { %v938_v57 = vpack.i.bf16 %v463_v56, %v462_v54 }
  0xca   : > { %312 = vrot.lane.b32.xlu0 %v1324_v5, %s1173_s13 }
  0xcc   : > { %v1368_v47 = vpop.permute.xlu0 %904 }
  0xcd   : > { %v907_v48 = vunpack.i.h.bf16 %v1368_v47  ;;  %v906_v49 = vunpack.i.l.bf16 %v1368_v47 }
  0xcf   : > { %919 = vrot.lane.b32.xlu1 %v918_v40, %s1177_s26  ;;  %310 = vrot.lane.b32.xlu2 %v1320_v3, %s1173_s13  ;;  %v427_v50 = vsel %vm314_vm5, %v906_v49, %v907_v48  ;;  %s1107_s13 = sshra.s32 %s651_s9, 4  ;;  %s1113_s26 = scalar_lea.hbm %s1474_s3, 32  ;;  %s1108_s13 = int_to_ptr.hbm [resolvable:$true] %s1107_s13 }
  0xd0   : > { %v943_v51 = vpack.i.bf16 %v427_v50, %v906_v49  ;;  %s1109_s14 = scalar_lea.hbm %s1108_s13, 16  ;;  %p1114_p9 = scmp.lt.s32.totalorder %s1108_s13, %s1474_s3 }
  0xd1   : > { %p1110_p1 = scmp.ne.s32.totalorder %s1108_s13, %s1109_s14  ;;  %p1115_p2 = scmp.lt.s32.totalorder %s1113_s26, %s1109_s14 }
  0xd2   : > { %944 = vrot.lane.b32.xlu0 %v943_v51, %s1167_s29 }
  0xd3   : > { %p1111_p4 = pnand %p1110_p1, %p1276_p3  ;;  %p1116_p10 = por %p1115_p2, %p1114_p9 }
  0xd5   : > { %p1112_p8 = pneg %p1111_p4 }
  0xd7   : > { %924 = vrot.lane.b32.xlu1 %v923_v44, %s1178_s27  ;;  %395 = vrot.lane.b32.xlu2 %v1334_v7, %s1170_s24  ;;  %p1117_p11 = pnand %p1116_p10, %p1112_p8 }
  0xdf   : > { %934 = vrot.lane.b32.xlu1 %v933_v45, %s1170_s24  ;;  %939 = vrot.lane.b32.xlu2 %v938_v57, %s1167_s29  ;;  %s648_s24 = sshll.u32 %s272_s8, 4  ;;  %s649_s24 = int_to_ptr.vmem [resolvable:$true] %s648_s24 }
 0x109   : > { %v472_v58 = vpop.permute.xlu2 %471 }
 0x111   : > { %v436_v59 = vpop.permute.xlu2 %435 }
 0x119   : > { %v419_v60 = vpop.permute.xlu2 %418 }
 0x121   : > { %v915_v1 = vpop.permute.xlu2 %914 }
 0x122   : > { %v448_v2 = vpop.permute.xlu0 %447  ;;  %v917_v5 = vunpack.i.h.bf16 %v915_v1  ;;  %v916_v8 = vunpack.i.l.bf16 %v915_v1 }
 0x124   : > { %v450_v10 = vsel %vm449_vm8, %v916_v8, %v917_v5  ;;  %v451_v42 = vsel %vm449_vm8, %v917_v5, %v448_v2 }
 0x125   : > { %v963_v16 = vpack.i.bf16 %v450_v10, %v916_v8 }
 0x129   : > { %v311_v20 = vpop.permute.xlu2 %310 }
 0x12a   : > { %v319_v29 = vmul.f32 0.0, %v311_v20 }
 0x131   : > { %v407_v61 = vpop.permute.xlu1 %406  ;;  %v396_v32 = vpop.permute.xlu2 %395 }
 0x134   : > { %v930_v13 = vpop.permute.xlu0 %929 }
 0x135   : > { %v932_v18 = vunpack.i.h.bf16 %v930_v13  ;;  %v931_v19 = vunpack.i.l.bf16 %v930_v13 }
 0x137   : > { %v409_v23 = vsel %vm408_vm10, %v931_v19, %v932_v18  ;;  %v410_v24 = vsel %vm408_vm10, %v932_v18, %v407_v61 }
 0x138   : > { %v993_v27 = vpack.i.bf16 %v410_v24, %v409_v23 }
 0x139   : > { %v910_v62 = vpop.permute.xlu1 %909  ;;  %v940_v55 = vpop.permute.xlu2 %939 }
 0x13a   : > { %v912_v63 = vunpack.i.h.bf16 %v910_v62  ;;  %v911_v0 = vunpack.i.l.bf16 %v910_v62  ;;  %v941_v47 = vunpack.i.l.bf16 %v940_v55 }
 0x13c   : > { %v474_v3 = vsel %vm473_vm7, %v911_v0, %v912_v63  ;;  %v313_v28 = vpop.permute.xlu0 %312  ;;  %v475_v41 = vsel %vm473_vm7, %v912_v63, %v472_v58 }
 0x13d   : > { %v953_v4 = vpack.i.bf16 %v474_v3, %v911_v0  ;;  %v315_v30 = vsel %vm314_vm5, %v311_v20, %v313_v28  ;;  %v321_v50 = vmul.f32 %v313_v28, %v1334_v7 }
 0x13e   : > { %v320_v33 = vmul.f32 %v315_v30, %v1332_v6  ;;  %v958_v6 = vpack.i.bf16 %v901_v53, %v475_v41  ;;  %v476_v41 = vld [vmem:[#allocation6] sm:$0xff] }
 0x13f   : > { %954 = vrot.lane.b32.xlu0 %v953_v4, %s1167_s29 }
 0x140   : > { %v998_v38 = vpack.i.bf16 %v320_v33, %v319_v29 }
 0x141   : > { %v920_v9 = vpop.permute.xlu1 %919 }
 0x142   : > { %v922_v11 = vunpack.i.h.bf16 %v920_v9  ;;  %v921_v12 = vunpack.i.l.bf16 %v920_v9 }
 0x144   : > { %v438_v14 = vsel %vm437_vm9, %v921_v12, %v922_v11  ;;  %v439_v15 = vsel %vm437_vm9, %v922_v11, %v436_v59  ;;  %v968_v43 = vpack.i.bf16 %v921_v12, %v451_v42  ;;  %v945_v46 = vpop.permute.xlu0 %944  ;;  %v942_v59 = vunpack.i.h.bf16 %v940_v55 }
 0x145   : > { %v973_v17 = vpack.i.bf16 %v439_v15, %v438_v14  ;;  %v947_v4 = vunpack.i.h.bf16 %v945_v46  ;;  %v946_v5 = vunpack.i.l.bf16 %v945_v46 }
 0x146   : > { %v549_v2 = vsel %vm380_vm2, %v941_v47, %v942_v59 }
 0x147   : > { %974 = vrot.lane.b32.xlu2 %v973_v17, %s1167_s29  ;;  %964 = vrot.lane.b32.xlu0 %v963_v16, %s1167_s29  ;;  %v542_v16 = vsel %vm380_vm2, %v946_v5, %v947_v4 }
 0x149   : > { %v925_v21 = vpop.permute.xlu1 %924 }
 0x14a   : > { %v927_v22 = vunpack.i.h.bf16 %v925_v21  ;;  %v926_v44 = vunpack.i.l.bf16 %v925_v21 }
 0x14c   : > { %v422_v25 = vsel %vm420_vm11, %v927_v22, %v419_v60  ;;  %v421_v45 = vsel %vm420_vm11, %v926_v44, %v927_v22 }
 0x14d   : > { %v983_v26 = vpack.i.bf16 %v419_v60, %v422_v25  ;;  %v978_v49 = vpack.i.bf16 %v421_v45, %v907_v48 }
 0x14f   : > { %984 = vrot.lane.b32.xlu2 %v983_v26, %s1167_s29  ;;  %994 = vrot.lane.b32.xlu0 %v993_v27, %s1167_s29 }
 0x151   : > { %v935_v31 = vpop.permute.xlu1 %934 }
 0x152   : > { %v937_v34 = vunpack.i.h.bf16 %v935_v31  ;;  %v936_v35 = vunpack.i.l.bf16 %v935_v31 }
 0x154   : > { %v398_v36 = vsel %vm341_vm4, %v937_v34, %v396_v32  ;;  %v397_v37 = vsel %vm341_vm4, %v936_v35, %v937_v34 }
 0x155   : > { %v988_v39 = vpack.i.bf16 %v396_v32, %v398_v36  ;;  %v948_v40 = vpack.i.bf16 %v397_v37, %v407_v61 }
 0x157   : > { %949 = vrot.lane.b32.xlu1 %v948_v40, %s1167_s29  ;;  %989 = vrot.lane.b32.xlu2 %v988_v39, %s1167_s29 }
 0x158   : > { %999 = vrot.lane.b32.xlu0 %v998_v38, %s1167_s29 }
 0x15f   : > { %959 = vrot.lane.b32.xlu1 %v958_v6, %s1167_s29 }
 0x167   : > { %969 = vrot.lane.b32.xlu1 %v968_v43, %s1167_s29 }
 0x16f   : > { %979 = vrot.lane.b32.xlu1 %v978_v49, %s1167_s29 }
 0x177   : > { %484 = vrot.lane.b32.xlu1 %v321_v50, %s1167_s29 }
 0x1a1   : > { %v975_v57 = vpop.permute.xlu2 %974 }
 0x1a2   : > { %v977_v10 = vunpack.i.h.bf16 %v975_v57  ;;  %v976_v11 = vunpack.i.l.bf16 %v975_v57 }
 0x1a4   : > { %v545_v17 = vsel %vm380_vm2, %v976_v11, %v977_v10 }
 0x1a9   : > { %v985_v3 = vpop.permute.xlu2 %984 }
 0x1aa   : > { %v987_v18 = vunpack.i.h.bf16 %v985_v3  ;;  %v986_v19 = vunpack.i.l.bf16 %v985_v3 }
 0x1ac   : > { %v541_v35 = vsel %vm380_vm2, %v986_v19, %v987_v18 }
 0x1b1   : > { %v955_v51 = vpop.permute.xlu0 %954  ;;  %v990_v26 = vpop.permute.xlu2 %989 }
 0x1b2   : > { %v957_v52 = vunpack.i.h.bf16 %v955_v51  ;;  %v956_v53 = vunpack.i.l.bf16 %v955_v51  ;;  %v992_v33 = vunpack.i.h.bf16 %v990_v26  ;;  %v991_v34 = vunpack.i.l.bf16 %v990_v26 }
 0x1b4   : > { %v550_v54 = vsel %vm380_vm2, %v956_v53, %v957_v52  ;;  %v537_v6 = vsel %vm380_vm2, %v991_v34, %v992_v33 }
 0x1b5   : > { %581 = vmatpush.msra.mxu0 %v550_v54 }
 0x1b9   : > { %v965_v58 = vpop.permute.xlu0 %964 }
 0x1ba   : > { %v967_v60 = vunpack.i.h.bf16 %v965_v58  ;;  %v966_v61 = vunpack.i.l.bf16 %v965_v58 }
 0x1bc   : > { %v546_v1 = vsel %vm380_vm2, %v966_v61, %v967_v60 }
 0x1c1   : > { %v995_v8 = vpop.permute.xlu0 %994 }
 0x1c2   : > { %v997_v22 = vunpack.i.h.bf16 %v995_v8  ;;  %v996_v23 = vunpack.i.l.bf16 %v995_v8 }
 0x1c4   : > { %v538_v36 = vsel %vm380_vm2, %v996_v23, %v997_v22 }
 0x1c9   : > { %v950_v56 = vpop.permute.xlu1 %949 }
 0x1ca   : > { %v1000_v21 = vpop.permute.xlu0 %999  ;;  %v952_v27 = vunpack.i.h.bf16 %v950_v56  ;;  %v951_v28 = vunpack.i.l.bf16 %v950_v56 }
 0x1cb   : > { %v1002_v31 = vunpack.i.h.bf16 %v1000_v21  ;;  %v1001_v32 = vunpack.i.l.bf16 %v1000_v21 }
 0x1cc   : > { %v536_v37 = vsel %vm380_vm2, %v952_v27, %v991_v34  ;;  %v539_v38 = vsel %vm380_vm2, %v997_v22, %v951_v28 }
 0x1cd   : > { %v534_v39 = vsel %vm380_vm2, %v1001_v32, %v1002_v31 }
 0x1d1   : > { %v960_v48 = vpop.permute.xlu1 %959 }
 0x1d2   : > { %v962_v62 = vunpack.i.h.bf16 %v960_v48  ;;  %v961_v7 = vunpack.i.l.bf16 %v960_v48 }
 0x1d4   : > { %v548_v63 = vsel %vm380_vm2, %v962_v62, %v941_v47  ;;  %v551_v0 = vsel %vm380_vm2, %v957_v52, %v961_v7 }
 0x1d5   : > { %582 = vmatpush.msra.mxu0 %v548_v63  ;;  %601 = vmatpush.msra.mxu1 %v551_v0 }
 0x1d7   : > { %583 = vmatpush.msra.mxu0 %v546_v1  ;;  %602 = vmatpush.msra.mxu1 %v549_v2 }
 0x1d9   : > { %v970_v9 = vpop.permute.xlu1 %969 }
 0x1da   : > { %v972_v12 = vunpack.i.h.bf16 %v970_v9  ;;  %v971_v13 = vunpack.i.l.bf16 %v970_v9 }
 0x1dc   : > { %v544_v14 = vsel %vm380_vm2, %v972_v12, %v976_v11  ;;  %v547_v15 = vsel %vm380_vm2, %v967_v60, %v971_v13 }
 0x1dd   : > { %584 = vmatpush.msra.mxu0 %v544_v14  ;;  %603 = vmatpush.msra.mxu1 %v547_v15 }
 0x1df   : > { %585 = vmatpush.msra.mxu0 %v542_v16  ;;  %604 = vmatpush.msra.mxu1 %v545_v17 }
 0x1e1   : > { %v980_v20 = vpop.permute.xlu1 %979 }
 0x1e2   : > { %v982_v24 = vunpack.i.h.bf16 %v980_v20  ;;  %v981_v25 = vunpack.i.l.bf16 %v980_v20 }
 0x1e4   : > { %v540_v29 = vsel %vm380_vm2, %v982_v24, %v986_v19  ;;  %v543_v30 = vsel %vm380_vm2, %v947_v4, %v981_v25 }
 0x1e5   : > { %586 = vmatpush.msra.mxu0 %v540_v29  ;;  %605 = vmatpush.msra.mxu1 %v543_v30 }
 0x1e7   : > { %606 = vmatpush.msra.mxu1 %v541_v35  ;;  %587 = vmatpush.msra.mxu0 %v538_v36 }
 0x1e9   : > { %v485_v40 = vpop.permute.xlu1 %484  ;;  %588 = vmatpush.msra.mxu0 %v536_v37  ;;  %607 = vmatpush.msra.mxu1 %v539_v38 }
 0x1ea   : > { %v535_v42 = vsel %vm380_vm2, %v1002_v31, %v485_v40 }
 0x1eb   : > { %608 = vmatpush.msra.mxu1 %v537_v6  ;;  %589 = vmatpush.msra.mxu0 %v534_v39 }
 0x1ec   : > { %809 = vmatmul.msk.f32.vlgmr.msra.gmra.mxu0 %vm570_vm12, %v476_v41 }
 0x1ed   : > { %609 = vmatpush.msra.mxu1 %v535_v42 }
 0x1ee   : > { %810 = vmatmul.msk.f32.vlgmr.msra.gmra.mxu1 %vm570_vm12, %v476_v41 }
 0x269   : > { %v591_v43 = vpop.f32.mrf.mxu0 }
 0x26a   : > { %614 = vst [vmem:[%s272_s8] sm:$0xff] %v591_v43  ;;  %v620_v44 = vmul.f32 %v591_v43, %v591_v43 }
 0x26b   : > { %v611_v45 = vpop.f32.mrf.mxu1 }
 0x26c   : > { %615 = vst [vmem:[%s272_s8 + $0x8] sm:$0xff] %v611_v45  ;;  %v621_v49 = vmul.f32 %v611_v45, %v611_v45  ;;  %v616_v50 = vadd.f32 %v611_v45, %v591_v43 }
 0x26d   : > { %1120 = shalt.err (!%p1117_p11)
}
 0x26e   : > { %828 = dma.vmem_to_hbm [thread:$0]  (%p1276_p3), %s649_s24, 256, %s651_s9, %s627_s10   ;;  %617 = vadd.xlane.f32.xlu2 %v616_v50  ;;  %v622_v46 = vadd.f32 %v621_v49, %v620_v44 }
 0x26f   : > { %p285_p12 = scmp.lt.s32.totalorder %s1231_s22, 1 }
 0x270   : > { %623 = vadd.xlane.f32.xlu0 %v622_v46 }
 0x271   : > { %s1488_s22 = smov (!%p285_p12, %s1231_s22), 1 }
 0x272   : > { %s807_s17 = sshll.u32 %s1488_s22, 3 }
 0x273   : > { %s288_s29 = scalar_lea.vmem %s1475_s4, %s807_s17  ;;  %s292_s13 = scalar_lea.vmem %s1476_s5, %s807_s17 }
 0x2e1   : > { %v618_v51 = vpop.xlane.xlu2 %617 }
 0x2e2   : > { %619 = vst.msk [vmem:[%s288_s29] sm:$0xff] %vm356_vm3, %v618_v51 }
 0x2e3   : > { %v624_v52 = vpop.xlane.xlu0 %623 }
 0x2e4   : > { %625 = vst.msk [vmem:[%s292_s13] sm:$0xff] %vm356_vm3, %v624_v52 }
 0x2e5 PF: > { %s668_s15 = sand.u32 1, %s1151_s18   ;;  %p1482_p3 = scmp.ge.s32.totalorder %s1163_s21, 2 }
 0x2e6   : > { %s669_s22 = scalar_lea.sflag [#allocation5], %s668_s15 }
 0x2e7   : > { %p842_p13 = pnand %p1482_p3, %p1245_p6 }
 0x2e9   : > { %p843_p0 = pneg %p842_p13 }
 0x2eb   : > { %1146 = dma.done.wait (%p843_p0), %s669_s22, 256  }
 0x2ec   : > { %1148 = vsyncadd (%p843_p0), %s669_s22, 4294967040  ;;  %p20_p5 = scmp.ge.s32.totalorder %s1266_s12, 4   ;;  %s1483_s18 = smov %s1155_s19 }
 0x2ed   : > { %s1484_s19 = smov %s1159_s20  ;;  %s1485_s20 = smov %s1282_s16 }
 0x2ee   : > { %s1486_s21 = smov %s1266_s12  ;;  %22 = sbr.rel (!%p20_p5) target bundleno = 6 (0x6), region = 110 }
 0x2f3   :  { %689 = vsyncpa [#allocation4], 1 }
 0x2f4   :  { %691 = vsyncpa [#allocation4 + $0x1], 1 }
 0x2f5   :  { %692 = vsyncpa [#allocation7], 1 }
 0x2f6   :  { %693 = vsyncpa [#allocation5], 1 }
 0x2f7   :  { %695 = vsyncpa [#allocation5 + $0x1], 1 }

</bundles_post_ra>
